<compile_context>
chip_gen: v6e
topology: v6e:2x2x1
jax: 0.10.0
libtpu: 0.0.40
codegen_flags: <defaults>
</compile_context>

<pallas_src>
import numpy as np
import jax
import jax.numpy as jnp
from jax.experimental import pallas as pl
from jax.experimental.pallas import tpu as pltpu

# ----- module hyper-parameters (from RegionLoss.__init__) -------------------
NUM_CLASSES = 20
ANCHORS = [1.3221, 1.73145, 3.19275, 4.00944, 5.05587,
           8.09892, 9.47112, 4.84053, 11.2364, 10.0071]
NUM_ANCHORS = 5
ANCHOR_STEP = len(ANCHORS) // NUM_ANCHORS
COORD_SCALE = 1.0
NOOBJECT_SCALE = 1.0
OBJECT_SCALE = 1.0
CLASS_SCALE = 1.0
SIL_THRESH = 0.6


def _round_up(x, m):
    return ((x + m - 1) // m) * m


def _pick_row_block(nBA_pad, bytes_per_row):
    """Pick the row-block size.  Prefer one big block (grid=1): the fixed
    ~0.35us/step pipeline overhead dominates at these sizes and v5e/v6e have a
    single TensorCore anyway.  Split into 2 'parallel' blocks (v7x megacore)
    only when each half still moves >= 1 MiB, and keep well inside the default
    scoped-VMEM budget."""
    tr = nBA_pad
    if tr % 16 == 0 and (tr // 2) * bytes_per_row >= (1 << 20):
        tr //= 2
    while tr % 16 == 0 and 2 * tr * bytes_per_row > (12 << 20):
        tr //= 2
    return tr


def _sigmoid(v):
    # single-transcendental sigmoid (one EUP push instead of exp + divide)
    return 0.5 * jnp.tanh(0.5 * v) + 0.5


# ============================ Pallas kernels ================================

def make_decode_call(nBA_pad, HW_pad, TR):
    grid_n = nBA_pad // TR

    def decode_kernel(box_ref, aw_ref, ah_ref, gx_ref, gy_ref, pb_ref):
        x = _sigmoid(box_ref[0])
        y = _sigmoid(box_ref[1])
        w = jnp.exp(box_ref[2])
        h = jnp.exp(box_ref[3])

        pb_ref[0] = x + gx_ref[...]                # (1,HW) broadcasts over rows
        pb_ref[1] = y + gy_ref[...]
        # NOTE: the PyTorch reference applies exp() a second time on the
        # already-exp'd w/h when building pred_boxes; reproduced verbatim.
        pb_ref[2] = jnp.exp(w) * aw_ref[...]       # (TR,1) broadcasts over lanes
        pb_ref[3] = jnp.exp(h) * ah_ref[...]

    return pl.pallas_call(
        decode_kernel,
        out_shape=jax.ShapeDtypeStruct((4, nBA_pad, HW_pad), jnp.float32),
        grid=(grid_n,),
        in_specs=[
            pl.BlockSpec((4, TR, HW_pad), lambda i: (0, i, 0)),
            pl.BlockSpec((TR, 1), lambda i: (i, 0)),
            pl.BlockSpec((TR, 1), lambda i: (i, 0)),
            pl.BlockSpec((1, HW_pad), lambda i: (0, 0)),
            pl.BlockSpec((1, HW_pad), lambda i: (0, 0)),
        ],
        out_specs=pl.BlockSpec((4, TR, HW_pad), lambda i: (0, i, 0)),
        compiler_params=pltpu.CompilerParams(
            dimension_semantics=("parallel",)),
    )


def make_loss_call(nBA_pad, HW_pad, TR, Lpad, Rpad):
    grid_n = nBA_pad // TR

    def loss_kernel(conf_ref, tgt2_ref, selraw_ref, seltgt_ref,
                    logits_ref, labels_ref, part_ref):
        # --- dense confidence term (only dense work left) -------------------
        conf = _sigmoid(conf_ref[...])
        tconf = tgt2_ref[0]
        confm = tgt2_ref[1]          # conf_mask (noobject/object scale), 0 in pad
        dc = conf - tconf
        loss_conf = 0.5 * jnp.sum(confm * dc * dc)

        r = jax.lax.broadcasted_iota(jnp.int32, (8, 128), 0)
        c = jax.lax.broadcasted_iota(jnp.int32, (8, 128), 1)
        mask00 = (r == 0) & (c == 0)
        part_ref[0] = jnp.where(mask00, loss_conf, 0.0)

        # --- gathered GT-cell terms: coord SSE + class CE, computed once ----
        @pl.when(pl.program_id(0) == 0)
        def _():
            vl = seltgt_ref[4]                      # (1, Lpad) validity (0/1)
            px = _sigmoid(selraw_ref[0])
            py = _sigmoid(selraw_ref[1])
            pw = jnp.exp(selraw_ref[2])
            ph = jnp.exp(selraw_ref[3])

            def sse(a, b):
                d = vl * (a - b)
                return jnp.sum(d * d)

            loss_coord = COORD_SCALE * 0.5 * (
                sse(px, seltgt_ref[0]) + sse(py, seltgt_ref[1])
                + sse(pw, seltgt_ref[2]) + sse(ph, seltgt_ref[3]))

            logits = logits_ref[...]                # (Rpad, 128); pads = -1e9
            m = jnp.max(logits, axis=-1, keepdims=True)
            lse = m + jnp.log(jnp.sum(jnp.exp(logits - m), axis=-1,
                                      keepdims=True))
            onehot = (jax.lax.broadcasted_iota(jnp.int32, logits.shape, 1)
                      == labels_ref[...]).astype(jnp.float32)   # label=-1 => 0
            logp_true = jnp.sum(onehot * (logits - lse), axis=-1, keepdims=True)
            loss_cls = CLASS_SCALE * jnp.sum(-logp_true)

            part_ref[0] = jnp.where(
                mask00, loss_conf + loss_coord + loss_cls, 0.0)

    return pl.pallas_call(
        loss_kernel,
        out_shape=jax.ShapeDtypeStruct((grid_n, 8, 128), jnp.float32),
        grid=(grid_n,),
        in_specs=[
            pl.BlockSpec((TR, HW_pad), lambda i: (i, 0)),
            pl.BlockSpec((2, TR, HW_pad), lambda i: (0, i, 0)),
            pl.BlockSpec((4, 1, Lpad), lambda i: (0, 0, 0)),
            pl.BlockSpec((5, 1, Lpad), lambda i: (0, 0, 0)),
            pl.BlockSpec((Rpad, 128), lambda i: (0, 0)),
            pl.BlockSpec((Rpad, 1), lambda i: (0, 0)),
        ],
        out_specs=pl.BlockSpec((1, 8, 128), lambda i: (i, 0, 0)),
        compiler_params=pltpu.CompilerParams(
            dimension_semantics=("parallel",)),
    )


# ====================== host-side build_targets (NumPy) =====================

def _bbox_iou_np(box1, box2):
    # x1y1x2y2=False variant (cx, cy, w, h)
    mx = min(box1[0] - box1[2] / 2.0, box2[0] - box2[2] / 2.0)
    Mx = max(box1[0] + box1[2] / 2.0, box2[0] + box2[2] / 2.0)
    my = min(box1[1] - box1[3] / 2.0, box2[1] - box2[3] / 2.0)
    My = max(box1[1] + box1[3] / 2.0, box2[1] + box2[3] / 2.0)
    w1, h1, w2, h2 = box1[2], box1[3], box2[2], box2[3]
    uw, uh = Mx - mx, My - my
    cw, ch = w1 + w2 - uw, h1 + h2 - uh
    if cw <= 0 or ch <= 0:
        return 0.0
    carea = cw * ch
    uarea = w1 * h1 + w2 * h2 - carea
    return carea / uarea


def _bbox_ious_np(b1, b2):
    # b1, b2: (4, N) in (cx, cy, w, h)
    mx = np.minimum(b1[0] - b1[2] / 2.0, b2[0] - b2[2] / 2.0)
    Mx = np.maximum(b1[0] + b1[2] / 2.0, b2[0] + b2[2] / 2.0)
    my = np.minimum(b1[1] - b1[3] / 2.0, b2[1] - b2[3] / 2.0)
    My = np.maximum(b1[1] + b1[3] / 2.0, b2[1] + b2[3] / 2.0)
    w1, h1, w2, h2 = b1[2], b1[3], b2[2], b2[3]
    uw, uh = Mx - mx, My - my
    cw, ch = w1 + w2 - uw, h1 + h2 - uh
    bad = (cw <= 0) | (ch <= 0)
    carea = cw * ch
    carea = np.where(bad, 0.0, carea)
    uarea = w1 * h1 + w2 * h2 - carea
    return carea / uarea


def build_targets_np(pred_boxes, target, anchors_list, nA, nC, nH, nW,
                     noobject_scale, object_scale, sil_thresh):
    MAX_BBOX, THRESH_IOU = 50, 0.5
    nB = target.shape[0]
    anchor_step = len(anchors_list) // nA
    shape = (nB, nA, nH, nW)
    coord_mask = np.zeros(shape, np.float32)
    conf_mask = np.ones(shape, np.float32) * noobject_scale
    cls_mask = np.zeros(shape, np.float32)
    tx = np.zeros(shape, np.float32)
    ty = np.zeros(shape, np.float32)
    tw = np.zeros(shape, np.float32)
    th = np.zeros(shape, np.float32)
    tconf = np.zeros(shape, np.float32)
    tcls = np.zeros(shape, np.float32)
    nAnchors, nPixels = nA * nH * nW, nH * nW

    for b in range(nB):
        cur_pred_boxes = pred_boxes[b * nAnchors:(b + 1) * nAnchors].T
        cur_ious = np.zeros(nAnchors, np.float64)
        for t in range(MAX_BBOX):
            if target[b][t * 5 + 1] == 0:
                break
            gx = target[b][t * 5 + 1] * nW
            gy = target[b][t * 5 + 2] * nH
            gw = target[b][t * 5 + 3] * nW
            gh = target[b][t * 5 + 4] * nH
            cur_gt = np.tile(np.array([gx, gy, gw, gh]).reshape(4, 1),
                             (1, nAnchors))
            cur_ious = np.maximum(cur_ious,
                                  _bbox_ious_np(cur_pred_boxes, cur_gt))
        conf_mask[b][cur_ious.reshape(nA, nH, nW) > sil_thresh] = 0

    nGT, nCorrect = 0, 0
    for b in range(nB):
        for t in range(MAX_BBOX):
            if target[b][t * 5 + 1] == 0:
                break
            nGT += 1
            best_iou, best_n = 0.0, -1
            gx = target[b][t * 5 + 1] * nW
            gy = target[b][t * 5 + 2] * nH
            gw = target[b][t * 5 + 3] * nW
            gh = target[b][t * 5 + 4] * nH
            gi, gj = int(gx), int(gy)
            gt_box = [0, 0, gw, gh]
            for n in range(nA):
                aw = anchors_list[anchor_step * n]
                ah = anchors_list[anchor_step * n + 1]
                iou = _bbox_iou_np([0, 0, aw, ah], gt_box)
                if iou > best_iou:
                    best_iou, best_n = iou, n
            coord_mask[b, best_n, gj, gi] = 1
            conf_mask[b, best_n, gj, gi] = object_scale
            cls_mask[b, best_n, gj, gi] = 1
            tx[b, best_n, gj, gi] = target[b][t * 5 + 1] * nW - gi
            ty[b, best_n, gj, gi] = target[b][t * 5 + 2] * nH - gj
            tw[b, best_n, gj, gi] = gw / anchors_list[anchor_step * best_n]
            th[b, best_n, gj, gi] = gh / anchors_list[anchor_step * best_n + 1]
            pred_box = pred_boxes[b * nAnchors + best_n * nPixels + gj * nW + gi]
            iou = _bbox_iou_np([gx, gy, gw, gh], pred_box)
            tconf[b, best_n, gj, gi] = iou
            tcls[b, best_n, gj, gi] = target[b][t * 5]
            if iou > THRESH_IOU:
                nCorrect += 1
    return (nGT, nCorrect, coord_mask, conf_mask, cls_mask,
            tx, ty, tw, th, tconf, tcls)


# ============================== forward pass ================================

def region_loss_forward(output, target):
    nB, C, nH, nW = output.shape
    nA, nC = NUM_ANCHORS, NUM_CLASSES
    assert C == nA * (5 + nC)
    nBA, HW = nB * nA, nH * nW
    nHW = HW

    HW_pad = _round_up(HW, 128)
    nBA_pad = _round_up(nBA, 8)

    out_r = output.reshape(nB, nA, 5 + nC, nH, nW)

    # ---- lane-dense raw box channels (4, nBA_pad, HW_pad); conf kept apart --
    box_raw = jnp.transpose(out_r[:, :, :4], (2, 0, 1, 3, 4)).reshape(4, nBA, HW)
    box_raw = jnp.pad(box_raw, ((0, 0), (0, nBA_pad - nBA), (0, HW_pad - HW)))
    conf_raw = out_r[:, :, 4].reshape(nBA, HW)
    conf_raw = jnp.pad(conf_raw, ((0, nBA_pad - nBA), (0, HW_pad - HW)))

    anchors = np.array(ANCHORS, np.float32).reshape(nA, ANCHOR_STEP)
    aw = np.zeros((nBA_pad, 1), np.float32)
    ah = np.zeros((nBA_pad, 1), np.float32)
    aw[:nBA, 0] = np.tile(anchors[:, 0], nB)
    ah[:nBA, 0] = np.tile(anchors[:, 1], nB)

    col = np.arange(HW_pad)
    gx = (col % nW).astype(np.float32).reshape(1, HW_pad)
    gy = (col // nW).astype(np.float32).reshape(1, HW_pad)

    # ---- kernel 1: decode -> stacked pred_boxes ----------------------------
    TRd = _pick_row_block(nBA_pad, 32 * HW_pad)          # 4 in + 4 out planes
    decode = make_decode_call(nBA_pad, HW_pad, TRd)
    pb = decode(box_raw, jnp.asarray(aw), jnp.asarray(ah),
                jnp.asarray(gx), jnp.asarray(gy))

    # slice on device BEFORE the D2H copy feeding host build_targets
    pb_np = np.asarray(pb[:, :nBA, :HW])                 # one compact transfer
    pred_boxes = pb_np.reshape(4, -1).T                  # (N, 4)

    # TODO(synk): build_targets is per-box scalar control flow with early
    # breaks / anchor argmax / scatter writes — no clean Pallas equivalent,
    # kept on the host in NumPy.
    (_, _, coord_mask, conf_mask, cls_mask,
     tx, ty, tw, th, tconf, tcls) = build_targets_np(
        pred_boxes, np.asarray(target), ANCHORS, nA, nC, nH, nW,
        NOOBJECT_SCALE, OBJECT_SCALE, SIL_THRESH)

    # ---- dense targets: conf term only (2 planes, one H2D copy) ------------
    tgt2 = np.zeros((2, nBA_pad, HW_pad), np.float32)
    tgt2[0, :nBA, :HW] = tconf.reshape(nBA, HW)
    tgt2[1, :nBA, :HW] = conf_mask.reshape(nBA, HW)

    # ---- gather the GT cells (coord SSE + class CE live only there) --------
    flat_sel = np.nonzero(cls_mask.reshape(-1) == 1)[0]
    nSel = int(flat_sel.shape[0])
    Lpad = _round_up(max(nSel, 1), 128)      # lane-padded tile for coord SSE
    Rpad = _round_up(max(nSel, 1), 8)        # row-padded tile for CE

    sel_tgt = np.zeros((5, 1, Lpad), np.float32)     # tx, ty, tw, th, valid
    sel_labels = np.full((Rpad, 1), -1, np.int32)    # -1 => padded row (no CE)
    if nSel > 0:
        b_i = flat_sel // (nA * nHW)
        rem = flat_sel % (nA * nHW)
        a_i = rem // nHW
        rem2 = rem % nHW
        j_i = rem2 // nW
        i_i = rem2 % nW
        raw_sel = out_r[b_i, a_i, :, j_i, i_i]            # (nSel, 5+nC) gather
        sel_raw = jnp.transpose(raw_sel[:, :4]).reshape(4, 1, nSel)
        sel_raw = jnp.pad(sel_raw, ((0, 0), (0, 0), (0, Lpad - nSel)))
        sel_logits = jnp.full((Rpad, 128), -1e9, jnp.float32)
        sel_logits = sel_logits.at[:nSel, :nC].set(raw_sel[:, 5:])
        for k, arr in enumerate((tx, ty, tw, th)):
            sel_tgt[k, 0, :nSel] = arr.reshape(-1)[flat_sel]
        sel_tgt[4, 0, :nSel] = 1.0
        sel_labels[:nSel, 0] = tcls.reshape(-1)[flat_sel].astype(np.int32)
    else:
        sel_raw = jnp.zeros((4, 1, Lpad), jnp.float32)
        sel_logits = jnp.full((Rpad, 128), -1e9, jnp.float32)

    # ---- kernel 2: dense conf loss + gated GT-cell coord/CE ----------------
    TRl = _pick_row_block(nBA_pad, 12 * HW_pad)           # 3 dense planes
    loss_call = make_loss_call(nBA_pad, HW_pad, TRl, Lpad, Rpad)
    partials = loss_call(conf_raw, jnp.asarray(tgt2), sel_raw,
                         jnp.asarray(sel_tgt), sel_logits,
                         jnp.asarray(sel_labels))
    return jnp.sum(partials) / nB


# ============================ NumPy reference ===============================

def reference_loss(output_np, target_np):
    nB, C, nH, nW = output_np.shape
    nA, nC = NUM_ANCHORS, NUM_CLASSES
    nBA, HW = nB * nA, nH * nW
    N = nBA * HW
    out = output_np.reshape(nBA, 5 + nC, HW).astype(np.float64)
    sig = lambda v: 1.0 / (1.0 + np.exp(-v))
    x, y = sig(out[:, 0]), sig(out[:, 1])
    w, h = np.exp(out[:, 2]), np.exp(out[:, 3])
    conf = sig(out[:, 4])
    cls = out[:, 5:, :].transpose(0, 2, 1).reshape(N, nC)
    col = np.arange(HW)
    gx, gy = (col % nW)[None, :], (col // nW)[None, :]
    anchors = np.array(ANCHORS).reshape(nA, ANCHOR_STEP)
    aw = np.tile(anchors[:, 0], nB).reshape(nBA, 1)
    ah = np.tile(anchors[:, 1], nB).reshape(nBA, 1)
    pred_boxes = np.stack([(x + gx).reshape(-1), (y + gy).reshape(-1),
                           (np.exp(w) * aw).reshape(-1),
                           (np.exp(h) * ah).reshape(-1)], 1)
    (_, _, coord_mask, conf_mask, cls_mask,
     tx, ty, tw, th, tconf, tcls) = build_targets_np(
        pred_boxes, target_np, ANCHORS, nA, nC, nH, nW,
        NOOBJECT_SCALE, OBJECT_SCALE, SIL_THRESH)
    cm = coord_mask.reshape(nBA, HW)
    scm = np.sqrt(conf_mask.reshape(nBA, HW))
    r = lambda a: a.reshape(nBA, HW)
    loss_x = COORD_SCALE * np.sum((x * cm - r(tx) * cm) ** 2) / 2.0
    loss_y = COORD_SCALE * np.sum((y * cm - r(ty) * cm) ** 2) / 2.0
    loss_w = COORD_SCALE * np.sum((w * cm - r(tw) * cm) ** 2) / 2.0
    loss_h = COORD_SCALE * np.sum((h * cm - r(th) * cm) ** 2) / 2.0
    loss_conf = np.sum((conf * scm - r(tconf) * scm) ** 2) / 2.0
    sel_mask = cls_mask.reshape(-1) == 1
    sel = cls[sel_mask]
    labels = tcls.reshape(-1)[sel_mask].astype(int)
    m = sel.max(1)
    lse = np.log(np.sum(np.exp(sel - m[:, None]), 1)) + m
    logp = sel[np.arange(len(labels)), labels] - lse
    loss_cls = CLASS_SCALE * np.sum(-logp)
    return (loss_x + loss_y + loss_w + loss_h + loss_conf + loss_cls) / nB


# ================================== main ====================================

if __name__ == "__main__":
    nB, nH, nW = 2, 8, 8
    nA, nC = NUM_ANCHORS, NUM_CLASSES

    key = jax.random.PRNGKey(0)
    output = jax.random.normal(key, (nB, nA * (5 + nC), nH, nW),
                               dtype=jnp.float32) * 0.5

    # target layout per box: [class, x, y, w, h] (normalized), 50 slots / image
    target = np.zeros((nB, 250), np.float32)
    target[0, 0:5] = [3.0, 0.52, 0.48, 0.30, 0.40]
    target[0, 5:10] = [7.0, 0.25, 0.75, 0.12, 0.20]
    target[1, 0:5] = [12.0, 0.60, 0.30, 0.50, 0.35]
    target_j = jnp.asarray(target)

    loss = region_loss_forward(output, target_j)
    loss = jax.block_until_ready(loss)

    ref = reference_loss(np.asarray(output, dtype=np.float64),
                         target.astype(np.float64))
    assert np.allclose(float(loss), float(ref), rtol=2e-3, atol=2e-3), \
        (float(loss), float(ref))
    print("KERNEL_OK")
</pallas_src>

<mosaic_0001>
module attributes {stable_mosaic.version = 11 : i64} {
  func.func @decode_kernel(%arg0: i32, %arg1: memref<4x16x128xf32, #tpu.memory_space<vmem>>, %arg2: memref<16x1xf32, #tpu.memory_space<vmem>>, %arg3: memref<16x1xf32, #tpu.memory_space<vmem>>, %arg4: memref<1x128xf32, #tpu.memory_space<vmem>>, %arg5: memref<1x128xf32, #tpu.memory_space<vmem>>, %arg6: memref<4x16x128xf32, #tpu.memory_space<vmem>>) attributes {dimension_semantics = [#tpu.dimension_semantics<parallel>], iteration_bounds = array<i64: 1>, scalar_prefetch = 0 : i64, scratch_operands = 0 : i64, tpu.core_type = #tpu.core_type<tc>, window_params = [{transform_indices = @transform_0, window_bounds = array<i64: 4, 16, 128>}, {transform_indices = @transform_1, window_bounds = array<i64: 16, 1>}, {transform_indices = @transform_2, window_bounds = array<i64: 16, 1>}, {pipeline_mode = #tpu.pipeline_mode<synchronous>, transform_indices = @transform_3, window_bounds = array<i64: 1, 128>}, {pipeline_mode = #tpu.pipeline_mode<synchronous>, transform_indices = @transform_4, window_bounds = array<i64: 1, 128>}, {transform_indices = @transform_5, window_bounds = array<i64: 4, 16, 128>}]} {
    %c0 = arith.constant 0 : index
    %c0_0 = arith.constant 0 : index
    %c0_1 = arith.constant 0 : index
    %0 = vector.load %arg1[%c0, %c0_0, %c0_1] : memref<4x16x128xf32, #tpu.memory_space<vmem>>, vector<1x16x128xf32>
    %1 = vector.shape_cast %0 : vector<1x16x128xf32> to vector<16x128xf32>
    %cst = arith.constant 5.000000e-01 : f32
    %2 = vector.broadcast %cst : f32 to vector<16x128xf32>
    %3 = arith.mulf %2, %1 : vector<16x128xf32>
    %4 = math.tanh %3 : vector<16x128xf32>
    %cst_2 = arith.constant 5.000000e-01 : f32
    %5 = vector.broadcast %cst_2 : f32 to vector<16x128xf32>
    %6 = arith.mulf %5, %4 : vector<16x128xf32>
    %cst_3 = arith.constant 5.000000e-01 : f32
    %7 = vector.broadcast %cst_3 : f32 to vector<16x128xf32>
    %8 = arith.addf %6, %7 : vector<16x128xf32>
    %c1 = arith.constant 1 : index
    %c0_4 = arith.constant 0 : index
    %c0_5 = arith.constant 0 : index
    %9 = vector.load %arg1[%c1, %c0_4, %c0_5] : memref<4x16x128xf32, #tpu.memory_space<vmem>>, vector<1x16x128xf32>
    %10 = vector.shape_cast %9 : vector<1x16x128xf32> to vector<16x128xf32>
    %cst_6 = arith.constant 5.000000e-01 : f32
    %11 = vector.broadcast %cst_6 : f32 to vector<16x128xf32>
    %12 = arith.mulf %11, %10 : vector<16x128xf32>
    %13 = math.tanh %12 : vector<16x128xf32>
    %cst_7 = arith.constant 5.000000e-01 : f32
    %14 = vector.broadcast %cst_7 : f32 to vector<16x128xf32>
    %15 = arith.mulf %14, %13 : vector<16x128xf32>
    %cst_8 = arith.constant 5.000000e-01 : f32
    %16 = vector.broadcast %cst_8 : f32 to vector<16x128xf32>
    %17 = arith.addf %15, %16 : vector<16x128xf32>
    %c2 = arith.constant 2 : index
    %c0_9 = arith.constant 0 : index
    %c0_10 = arith.constant 0 : index
    %18 = vector.load %arg1[%c2, %c0_9, %c0_10] : memref<4x16x128xf32, #tpu.memory_space<vmem>>, vector<1x16x128xf32>
    %19 = vector.shape_cast %18 : vector<1x16x128xf32> to vector<16x128xf32>
    %20 = math.exp %19 : vector<16x128xf32>
    %c3 = arith.constant 3 : index
    %c0_11 = arith.constant 0 : index
    %c0_12 = arith.constant 0 : index
    %21 = vector.load %arg1[%c3, %c0_11, %c0_12] : memref<4x16x128xf32, #tpu.memory_space<vmem>>, vector<1x16x128xf32>
    %22 = vector.shape_cast %21 : vector<1x16x128xf32> to vector<16x128xf32>
    %23 = math.exp %22 : vector<16x128xf32>
    %c0_13 = arith.constant 0 : index
    %c0_14 = arith.constant 0 : index
    %24 = vector.load %arg4[%c0_13, %c0_14] : memref<1x128xf32, #tpu.memory_space<vmem>>, vector<1x128xf32>
    %25 = vector.broadcast %24 : vector<1x128xf32> to vector<16x128xf32>
    %26 = arith.addf %8, %25 : vector<16x128xf32>
    %c0_15 = arith.constant 0 : index
    %c0_16 = arith.constant 0 : index
    %c0_17 = arith.constant 0 : index
    %27 = vector.load %arg6[%c0_15, %c0_16, %c0_17] : memref<4x16x128xf32, #tpu.memory_space<vmem>>, vector<1x16x128xf32>
    %28 = vector.shape_cast %27 : vector<1x16x128xf32> to vector<16x128xf32>
    %29 = vector.shape_cast %26 : vector<16x128xf32> to vector<1x16x128xf32>
    tpu.vector_store %arg6[%c0_15, %c0_16, %c0_17], %29 {strides = array<i32>} : memref<4x16x128xf32, #tpu.memory_space<vmem>>, vector<1x16x128xf32>,
    %c0_18 = arith.constant 0 : index
    %c0_19 = arith.constant 0 : index
    %30 = vector.load %arg5[%c0_18, %c0_19] : memref<1x128xf32, #tpu.memory_space<vmem>>, vector<1x128xf32>
    %31 = vector.broadcast %30 : vector<1x128xf32> to vector<16x128xf32>
    %32 = arith.addf %17, %31 : vector<16x128xf32>
    %c1_20 = arith.constant 1 : index
    %c0_21 = arith.constant 0 : index
    %c0_22 = arith.constant 0 : index
    %33 = vector.load %arg6[%c1_20, %c0_21, %c0_22] : memref<4x16x128xf32, #tpu.memory_space<vmem>>, vector<1x16x128xf32>
    %34 = vector.shape_cast %33 : vector<1x16x128xf32> to vector<16x128xf32>
    %35 = vector.shape_cast %32 : vector<16x128xf32> to vector<1x16x128xf32>
    tpu.vector_store %arg6[%c1_20, %c0_21, %c0_22], %35 {strides = array<i32>} : memref<4x16x128xf32, #tpu.memory_space<vmem>>, vector<1x16x128xf32>,
    %36 = math.exp %20 : vector<16x128xf32>
    %c0_23 = arith.constant 0 : index
    %c0_24 = arith.constant 0 : index
    %37 = vector.load %arg2[%c0_23, %c0_24] : memref<16x1xf32, #tpu.memory_space<vmem>>, vector<16x1xf32>
    %38 = vector.broadcast %37 : vector<16x1xf32> to vector<16x128xf32>
    %39 = arith.mulf %36, %38 : vector<16x128xf32>
    %c2_25 = arith.constant 2 : index
    %c0_26 = arith.constant 0 : index
    %c0_27 = arith.constant 0 : index
    %40 = vector.load %arg6[%c2_25, %c0_26, %c0_27] : memref<4x16x128xf32, #tpu.memory_space<vmem>>, vector<1x16x128xf32>
    %41 = vector.shape_cast %40 : vector<1x16x128xf32> to vector<16x128xf32>
    %42 = vector.shape_cast %39 : vector<16x128xf32> to vector<1x16x128xf32>
    tpu.vector_store %arg6[%c2_25, %c0_26, %c0_27], %42 {strides = array<i32>} : memref<4x16x128xf32, #tpu.memory_space<vmem>>, vector<1x16x128xf32>,
    %43 = math.exp %23 : vector<16x128xf32>
    %c0_28 = arith.constant 0 : index
    %c0_29 = arith.constant 0 : index
    %44 = vector.load %arg3[%c0_28, %c0_29] : memref<16x1xf32, #tpu.memory_space<vmem>>, vector<16x1xf32>
    %45 = vector.broadcast %44 : vector<16x1xf32> to vector<16x128xf32>
    %46 = arith.mulf %43, %45 : vector<16x128xf32>
    %c3_30 = arith.constant 3 : index
    %c0_31 = arith.constant 0 : index
    %c0_32 = arith.constant 0 : index
    %47 = vector.load %arg6[%c3_30, %c0_31, %c0_32] : memref<4x16x128xf32, #tpu.memory_space<vmem>>, vector<1x16x128xf32>
    %48 = vector.shape_cast %47 : vector<1x16x128xf32> to vector<16x128xf32>
    %49 = vector.shape_cast %46 : vector<16x128xf32> to vector<1x16x128xf32>
    tpu.vector_store %arg6[%c3_30, %c0_31, %c0_32], %49 {strides = array<i32>} : memref<4x16x128xf32, #tpu.memory_space<vmem>>, vector<1x16x128xf32>,
    return
  }
  func.func @transform_0(%arg0: i32) -> (i32, i32, i32) {
    %c0_i32 = arith.constant 0 : i32
    %c0_i32_0 = arith.constant 0 : i32
    %c0_i32_1 = arith.constant 0 : i32
    return %c0_i32, %arg0, %c0_i32_0 : i32, i32, i32
  }
  func.func @transform_1(%arg0: i32) -> (i32, i32) {
    %c0_i32 = arith.constant 0 : i32
    %c0_i32_0 = arith.constant 0 : i32
    return %arg0, %c0_i32 : i32, i32
  }
  func.func @transform_2(%arg0: i32) -> (i32, i32) {
    %c0_i32 = arith.constant 0 : i32
    %c0_i32_0 = arith.constant 0 : i32
    return %arg0, %c0_i32 : i32, i32
  }
  func.func @transform_3(%arg0: i32) -> (i32, i32) {
    %c0_i32 = arith.constant 0 : i32
    %c0_i32_0 = arith.constant 0 : i32
    %c0_i32_1 = arith.constant 0 : i32
    return %c0_i32, %c0_i32_0 : i32, i32
  }
  func.func @transform_4(%arg0: i32) -> (i32, i32) {
    %c0_i32 = arith.constant 0 : i32
    %c0_i32_0 = arith.constant 0 : i32
    %c0_i32_1 = arith.constant 0 : i32
    return %c0_i32, %c0_i32_0 : i32, i32
  }
  func.func @transform_5(%arg0: i32) -> (i32, i32, i32) {
    %c0_i32 = arith.constant 0 : i32
    %c0_i32_0 = arith.constant 0 : i32
    %c0_i32_1 = arith.constant 0 : i32
    return %c0_i32, %arg0, %c0_i32_0 : i32, i32, i32
  }
}

</mosaic_0001>

<bundles_post_ra>
// kernel: tpu_custom_call.1
= control target key start
LH: loop header
LB: loop body
LE: loop exit
PB: predicated region body
PF: predicated region fallthrough
CT: control target
= control target key end

     0   :  { %10 = vsyncpa [#allocation3], 0  ;;  %s294_s0 = inlined_call_operand.hbm [shape: f32[4,16,128], index: 0, kind: input, shape index: {}]   ;;  %s295_s1 = inlined_call_operand.vmem [shape: f32[16,1], index: 1, kind: input, shape index: {}]   ;;  %s296_s2 = inlined_call_operand.vmem [shape: f32[16,1], index: 2, kind: input, shape index: {}]   ;;  %s297_s3 = inlined_call_operand.vmem [shape: f32[1,128], index: 3, kind: input, shape index: {}]   ;;  %s298_s4 = inlined_call_operand.vmem [shape: f32[1,128], index: 4, kind: input, shape index: {}]   ;;  %s299_s5 = inlined_call_operand.hbm [shape: f32[4,16,128], index: 5, kind: output, shape index: {}]  }
   0x1   :  { %11 = vsyncpa [#allocation4], 0  ;;  %s229_s18 = smov [#allocation2]  }
   0x2   :  { %s17_s19 = sshll.u32 %s229_s18, 4  ;;  %s18_s19 = int_to_ptr.vmem [resolvable:$true] %s17_s19 }
   0x3   :  { %s193_s20 = scalar_lea.vmem %s18_s19, 1024  ;;  %p198_p1 = scmp.lt.s32.totalorder %s18_s19, %s18_s19 }
   0x4   :  { %p194_p0 = scmp.ne.s32.totalorder %s18_s19, %s193_s20  ;;  %p199_p2 = scmp.lt.s32.totalorder %s193_s20, %s193_s20 }
   0x6   :  { %p200_p3 = por %p199_p2, %p198_p1 }
   0x8   :  { %p201_p4 = pnand %p200_p3, %p194_p0 }
   0xa   :  { %204 = shalt.err (!%p201_p4)
}
   0xb   :  { %s230_s21 = smov 128   ;;  %s231_s22 = smov 8  }
   0xc   :  { %23 = dma.hbm_to_vmem [thread:$0]  %s294_s0, 1024, %s18_s19, [#allocation3], %s230_s21, %s230_s21, %s231_s22  }
   0xd   :  { %225 = dma.done.wait [#allocation3], 1024  }
   0xe   :  { %226 = vsyncadd [#allocation3], 4294966272  ;;  %v232_v0 = vmov 0   ;;  %v118_v1 = vld [vmem:[%s296_s2] sm:$0xff]  ;;  %v119_v3 = vld [vmem:[%s296_s2 + $0x8] sm:$0xff] }
   0xf   :  { %160 = vset.pattern.permute.xlu1 %v232_v0  ;;  %159 = vset.pattern.permute.xlu0 %v232_v0  ;;  %v97_v2 = vld [vmem:[%s295_s1] sm:$0xff]  ;;  %v98_v4 = vld [vmem:[%s295_s1 + $0x8] sm:$0xff]  ;;  %v46_v8 = vld [vmem:[#allocation2 + $0x10] sm:$0xff] }
  0x10   :  { %122 = vperm.xlu1 %160, %v118_v1   ;;  %101 = vperm.xlu0 %159, %v97_v2   ;;  %v35_v5 = vld [vmem:[#allocation2] sm:$0xff]  ;;  %v36_v6 = vld [vmem:[#allocation2 + $0x8] sm:$0xff]  ;;  %v47_v9 = vld [vmem:[#allocation2 + $0x18] sm:$0xff]  ;;  %v48_v11 = vmul.f32 0.5, %v46_v8 }
  0x11   :  { %v37_v7 = vmul.f32 0.5, %v35_v5  ;;  %v38_v10 = vmul.f32 0.5, %v36_v6  ;;  %v49_v12 = vmul.f32 0.5, %v47_v9  ;;  %v152_v18 = vld [vmem:[%s297_s3] ss:$0 sm:$0xff]  ;;  %v64_v31 = vld [vmem:[#allocation2 + $0x30] sm:$0xff] }
  0x12   :  { %v153_v24 = vld [vmem:[%s298_s4] ss:$0 sm:$0xff]  ;;  %v66_v33 = vmul.f32 1.442695, %v64_v31  ;;  %v65_v35 = vld [vmem:[#allocation2 + $0x38] sm:$0xff]  ;;  %v58_v36 = vld [vmem:[#allocation2 + $0x28] sm:$0xff] }
  0x13   :  { %161 = vtanh.f32 %v37_v7  ;;  %v57_v32 = vld [vmem:[#allocation2 + $0x20] sm:$0xff]  ;;  %v68_v37 = vmul.f32 1.442695, %v65_v35  ;;  %v61_v38 = vmul.f32 1.442695, %v58_v36  ;;  %s233_s3 = smov [#allocation5]  }
  0x14   :  { %127 = vperm.xlu1 %160, %v119_v3   ;;  %106 = vperm.xlu0 %159, %v98_v4   ;;  %163 = vtanh.f32 %v38_v10  ;;  %v59_v34 = vmul.f32 1.442695, %v57_v32  ;;  %s140_s4 = sshll.u32 %s233_s3, 4  ;;  %s141_s4 = int_to_ptr.vmem [resolvable:$true] %s140_s4 }
  0x15   :  { %165 = vtanh.f32 %v48_v11  ;;  %s205_s9 = scalar_lea.vmem %s141_s4, 1024  ;;  %p210_p6 = scmp.lt.s32.totalorder %s141_s4, %s141_s4 }
  0x16   :  { %167 = vtanh.f32 %v49_v12  ;;  %p206_p5 = scmp.ne.s32.totalorder %s141_s4, %s205_s9  ;;  %p211_p7 = scmp.lt.s32.totalorder %s205_s9, %s205_s9 }
  0x17   :  { %169 = vpow2.f32 %v66_v33 }
  0x18   :  { %171 = vpow2.f32 %v59_v34  ;;  %p212_p8 = por %p211_p7, %p210_p6 }
  0x19   :  { %173 = vpow2.f32 %v68_v37 }
  0x1a   :  { %175 = vpow2.f32 %v61_v38  ;;  %p213_p9 = pnand %p212_p8, %p206_p5 }
  0x20   :  { %v162_v13 = vpop.eup %161 }
  0x21   :  { %v164_v14 = vpop.eup %163  ;;  %v41_v15 = vmul.f32 0.5, %v162_v13 }
  0x22   :  { %v166_v16 = vpop.eup %165  ;;  %v42_v17 = vmul.f32 0.5, %v164_v14 }
  0x23   :  { %v168_v19 = vpop.eup %167  ;;  %v43_v20 = vadd.f32 0.5, %v41_v15  ;;  %v52_v21 = vmul.f32 0.5, %v166_v16 }
  0x24   :  { %v44_v22 = vadd.f32 0.5, %v42_v17  ;;  %v53_v23 = vmul.f32 0.5, %v168_v19  ;;  %v170_v39 = vpop.eup %169 }
  0x25   :  { %v54_v25 = vadd.f32 0.5, %v52_v21  ;;  %v77_v26 = vadd.f32 %v152_v18, %v43_v20  ;;  %v172_v40 = vpop.eup %171  ;;  %v114_v41 = vmul.f32 1.442695, %v170_v39 }
  0x26   :  { %v55_v27 = vadd.f32 0.5, %v53_v23  ;;  %v78_v28 = vadd.f32 %v152_v18, %v44_v22  ;;  %v174_v42 = vpop.eup %173  ;;  %v93_v43 = vmul.f32 1.442695, %v172_v40 }
  0x27   :  { %79 = vst [vmem:[#allocation5] sm:$0xff] %v77_v26  ;;  %v88_v29 = vadd.f32 %v153_v24, %v54_v25  ;;  %v176_v44 = vpop.eup %175  ;;  %177 = vpow2.f32 %v114_v41  ;;  %v116_v45 = vmul.f32 1.442695, %v174_v42 }
  0x28   :  { %80 = vst [vmem:[#allocation5 + $0x8] sm:$0xff] %v78_v28  ;;  %v89_v30 = vadd.f32 %v153_v24, %v55_v27  ;;  %179 = vpow2.f32 %v93_v43  ;;  %v95_v46 = vmul.f32 1.442695, %v176_v44 }
  0x29   :  { %91 = vst [vmem:[#allocation5 + $0x10] sm:$0xff] %v88_v29  ;;  %181 = vpow2.f32 %v116_v45 }
  0x2a   :  { %92 = vst [vmem:[#allocation5 + $0x18] sm:$0xff] %v89_v30  ;;  %183 = vpow2.f32 %v95_v46 }
  0x34   :  { %v178_v47 = vpop.eup %177 }
  0x35   :  { %v180_v48 = vpop.eup %179 }
  0x36   :  { %v182_v51 = vpop.eup %181 }
  0x37   :  { %v184_v54 = vpop.eup %183 }
  0x8b   :  { %v123_v49 = vpop.permute.xlu1 %122  ;;  %v102_v50 = vpop.permute.xlu0 %101 }
  0x8c   :  { %v130_v52 = vmul.f32 %v178_v47, %v123_v49  ;;  %v109_v53 = vmul.f32 %v180_v48, %v102_v50 }
  0x8e   :  { %133 = vst [vmem:[#allocation5 + $0x30] sm:$0xff] %v130_v52  ;;  %112 = vst [vmem:[#allocation5 + $0x20] sm:$0xff] %v109_v53 }
  0x8f   :  { %v128_v55 = vpop.permute.xlu1 %127  ;;  %v107_v56 = vpop.permute.xlu0 %106 }
  0x90   :  { %v131_v57 = vmul.f32 %v182_v51, %v128_v55  ;;  %v110_v58 = vmul.f32 %v184_v54, %v107_v56 }
  0x92   :  { %134 = vst [vmem:[#allocation5 + $0x38] sm:$0xff] %v131_v57  ;;  %113 = vst [vmem:[#allocation5 + $0x28] sm:$0xff] %v110_v58 }
  0x93   :  { %216 = shalt.err (!%p213_p9)
}
  0x94   :  { %146 = dma.vmem_to_hbm [thread:$0]  %s141_s4, 1024, %s299_s5, [#allocation4], %s230_s21, %s230_s21, %s231_s22  }
  0x95   :  { %227 = dma.done.wait [#allocation4], 1024  }
  0x96   :  { %228 = vsyncadd [#allocation4], 4294966272 }
  0x97   :  { %150 = vsyncpa [#allocation3], 1 }
  0x98   :  { %151 = vsyncpa [#allocation4], 1 }

</bundles_post_ra>
